<compile_context>
chip_gen: v7x
topology: tpu7x:2x2x1
jax: 0.10.0
libtpu: 0.0.40
codegen_flags: <defaults>
</compile_context>

<pallas_src>
import math

import jax
import jax.numpy as jnp
from jax.experimental import pallas as pl
from jax.experimental.pallas import tpu as pltpu


_VPU_CTX_MAX_D = 32  # below this, scores @ gru runs as a VPU broadcast-MAC


def _time_attention_kernel(enc_ref, w_ref, b_ref, gru_ref, scores_ref, ctx_ref):
    # enc_ref:    (bB, tT, C)
    # w_ref:      (C, D)
    # b_ref:      (1, D)
    # gru_ref:    (bB, D, H)
    # scores_ref: (bB, tT, D)
    # ctx_ref:    (bB, tT, H)
    bB, tT, C = enc_ref.shape
    D = w_ref.shape[1]
    H = gru_ref.shape[2]

    # ---- WX = enc @ W + b, flattened so the MXU sees M = bB*tT rows ----
    enc = enc_ref[...].reshape(bB * tT, C)                 # leading-dim collapse
    w = w_ref[...]                                         # (C, D)
    bias = b_ref[...]                                      # (1, D)
    wx = jnp.dot(enc, w, preferred_element_type=jnp.float32) + bias
    relu_wx = jnp.maximum(wx, 0.0)

    # ---- numerically stable softmax over D (kept in f32) ----
    m = jnp.max(relu_wx, axis=-1, keepdims=True)
    e = jnp.exp(relu_wx - m)
    denom = jnp.sum(e, axis=-1, keepdims=True)
    # Exact reciprocal: approx=True (EUP vrcp) is cheaper but its relative error
    # would not meet the 1e-5 tolerance of the reference check below.
    scores = e * pl.reciprocal(denom, approx=False)        # (bB*tT, D) f32

    scores3 = scores.reshape(bB, tT, D)                    # split leading dim
    scores_ref[...] = scores3.astype(scores_ref.dtype)

    # ---- context = scores @ bigru_out  (batched over bB) ----
    gru = gru_ref[...]                                     # (bB, D, H)
    if D <= _VPU_CTX_MAX_D:
        # K = D is far too small to occupy the MXU; an 8..32-term weighted sum
        # is essentially free on the VPU. Static unroll (D is small & static).
        ctx = jnp.zeros((bB, tT, H), dtype=jnp.float32)
        for d in range(D):
            ctx = ctx + scores3[:, :, d:d + 1] * gru[:, d:d + 1, :].astype(jnp.float32)
    else:
        ctx = jnp.einsum("btd,bdh->bth", scores3.astype(gru.dtype), gru,
                         preferred_element_type=jnp.float32)
    ctx_ref[...] = ctx.astype(ctx_ref.dtype)


def _choose_tiles(B, T, C, D, H, itemsize, budget_bytes):
    """Pick (bB, tT) so the double-buffered per-step working set fits VMEM."""
    def step_bytes(bB, tT):
        per_step = bB * tT * (C + D + H) + bB * D * H      # enc + scores + ctx + gru
        params = C * D + D                                 # weight + bias (resident)
        return (2 * per_step + params) * itemsize          # x2: double buffering

    if step_bytes(B, T) <= budget_bytes:
        return B, T                                        # whole problem, 1 grid step

    # Otherwise: one batch element per step, tile T with the largest fitting
    # multiple-of-8 divisor of T (last-two-dims constraint stays satisfied).
    tiles = [t for t in range(1, T + 1) if T % t == 0 and (t % 8 == 0 or t == T)]
    tT = tiles[0]                                          # best effort fallback
    for t in tiles:
        if step_bytes(1, t) <= budget_bytes:
            tT = t
    return 1, tT


def time_attention(enc_out, kernel, bias, bigru_out, *,
                   vmem_limit_bytes=48 * 1024 * 1024):
    """enc_out: (B, T, C); kernel: (C, D); bias: (D,); bigru_out: (B, D, H)."""
    B, T, C = enc_out.shape
    Cw, D = kernel.shape
    assert C == Cw
    Bb, Db, H = bigru_out.shape
    assert Bb == B and Db == D

    out_dtype = enc_out.dtype
    itemsize = jnp.dtype(out_dtype).itemsize

    # Budget tiles against roughly half the scoped VMEM limit for headroom.
    bB, tT = _choose_tiles(B, T, C, D, H, itemsize,
                           budget_bytes=vmem_limit_bytes // 2)
    nB, nT = B // bB, T // tT

    bias2d = bias.reshape(1, D)

    flops = 2 * B * T * C * D + 2 * B * T * D * H
    bytes_accessed = int(
        (enc_out.size + kernel.size + bias.size + bigru_out.size
         + B * T * D + B * T * H) * itemsize)
    cost = pl.CostEstimate(flops=flops,
                           transcendentals=B * T * D,
                           bytes_accessed=bytes_accessed)

    scores, ctx = pl.pallas_call(
        _time_attention_kernel,
        out_shape=(
            jax.ShapeDtypeStruct((B, T, D), out_dtype),
            jax.ShapeDtypeStruct((B, T, H), out_dtype),
        ),
        grid_spec=pltpu.PrefetchScalarGridSpec(
            num_scalar_prefetch=0,
            grid=(nB, nT),
            in_specs=[
                pl.BlockSpec((bB, tT, C), lambda i, j: (i, j, 0)),
                pl.BlockSpec((C, D), lambda i, j: (0, 0)),
                pl.BlockSpec((1, D), lambda i, j: (0, 0)),
                pl.BlockSpec((bB, D, H), lambda i, j: (i, 0, 0)),
            ],
            out_specs=[
                pl.BlockSpec((bB, tT, D), lambda i, j: (i, j, 0)),
                pl.BlockSpec((bB, tT, H), lambda i, j: (i, j, 0)),
            ],
        ),
        compiler_params=pltpu.CompilerParams(
            dimension_semantics=("parallel", "parallel"),
            vmem_limit_bytes=vmem_limit_bytes,
        ),
        cost_estimate=cost,
    )(enc_out, kernel, bias2d, bigru_out)
    return scores, ctx


def _reference(enc_out, kernel, bias, bigru_out):
    wx = jnp.einsum("btc,cd->btd", enc_out, kernel) + bias
    relu_wx = jnp.maximum(wx, 0.0)
    scores = jax.nn.softmax(relu_wx, axis=-1)
    ctx = jnp.einsum("btd,bdh->bth", scores, bigru_out)
    return scores, ctx


if __name__ == "__main__":
    # Small shapes consistent with the module.
    B, T = 2, 8          # batch, time steps of enc_out
    C_IN = 4             # in_channels
    D_OUT = 8            # output_dim (also the "time" dim of bigru_out)
    H = 32               # BiGRU hidden (feature) size

    key = jax.random.PRNGKey(0)
    k_enc, k_gru, k_w = jax.random.split(key, 3)

    enc_out = jax.random.normal(k_enc, (B, T, C_IN), dtype=jnp.float32)
    bigru_out = jax.random.normal(k_gru, (B, D_OUT, H), dtype=jnp.float32)

    # Deterministic parameter init matching nn.Parameter.uniform_(-stdv, stdv)
    stdv = 1.0 / math.sqrt(D_OUT)
    W = jax.random.uniform(k_w, (C_IN, D_OUT), minval=-stdv, maxval=stdv,
                           dtype=jnp.float32)
    b = jnp.zeros((D_OUT,), dtype=jnp.float32)

    scores, ctx = time_attention(enc_out, W, b, bigru_out)
    jax.block_until_ready((scores, ctx))

    ref_scores, ref_ctx = _reference(enc_out, W, b, bigru_out)
    assert jnp.allclose(scores, ref_scores, atol=1e-5, rtol=1e-5)
    assert jnp.allclose(ctx, ref_ctx, atol=1e-5, rtol=1e-5)

    print("KERNEL_OK")
</pallas_src>

<mosaic_0001>
module attributes {stable_mosaic.version = 11 : i64} {
  func.func @_time_attention_kernel(%arg0: i32, %arg1: i32, %arg2: memref<2x8x4xf32, #tpu.memory_space<vmem>>, %arg3: memref<4x8xf32, #tpu.memory_space<vmem>>, %arg4: memref<1x8xf32, #tpu.memory_space<vmem>>, %arg5: memref<2x8x32xf32, #tpu.memory_space<vmem>>, %arg6: memref<2x8x8xf32, #tpu.memory_space<vmem>>, %arg7: memref<2x8x32xf32, #tpu.memory_space<vmem>>) attributes {dimension_semantics = [#tpu.dimension_semantics<parallel>, #tpu.dimension_semantics<parallel>], iteration_bounds = array<i64: 1, 1>, scalar_prefetch = 0 : i64, scratch_operands = 0 : i64, tpu.core_type = #tpu.core_type<tc>, window_params = [{transform_indices = @transform_0, window_bounds = array<i64: 2, 8, 4>}, {pipeline_mode = #tpu.pipeline_mode<synchronous>, transform_indices = @transform_1, window_bounds = array<i64: 4, 8>}, {pipeline_mode = #tpu.pipeline_mode<synchronous>, transform_indices = @transform_2, window_bounds = array<i64: 1, 8>}, {transform_indices = @transform_3, window_bounds = array<i64: 2, 8, 32>}, {transform_indices = @transform_4, window_bounds = array<i64: 2, 8, 8>}, {transform_indices = @transform_5, window_bounds = array<i64: 2, 8, 32>}]} {
    %c0 = arith.constant 0 : index
    %c0_0 = arith.constant 0 : index
    %c0_1 = arith.constant 0 : index
    %0 = vector.load %arg2[%c0, %c0_0, %c0_1] : memref<2x8x4xf32, #tpu.memory_space<vmem>>, vector<2x8x4xf32>
    %1 = vector.shape_cast %0 : vector<2x8x4xf32> to vector<16x4xf32>
    %c0_2 = arith.constant 0 : index
    %c0_3 = arith.constant 0 : index
    %2 = vector.load %arg3[%c0_2, %c0_3] : memref<4x8xf32, #tpu.memory_space<vmem>>, vector<4x8xf32>
    %c0_4 = arith.constant 0 : index
    %c0_5 = arith.constant 0 : index
    %3 = vector.load %arg4[%c0_4, %c0_5] : memref<1x8xf32, #tpu.memory_space<vmem>>, vector<1x8xf32>
    %cst = arith.constant dense<0.000000e+00> : vector<16x8xf32>
    %4 = tpu.matmul %1, %2, %cst {dimension_numbers = #tpu.dot_dimension_numbers<[1], [0], [0], [1], [0, 0, 1, 1], [], []>} : vector<16x4xf32>, vector<4x8xf32>, vector<16x8xf32> -> vector<16x8xf32>
    %5 = vector.broadcast %3 : vector<1x8xf32> to vector<16x8xf32>
    %6 = arith.addf %4, %5 : vector<16x8xf32>
    %cst_6 = arith.constant 0.000000e+00 : f32
    %7 = vector.broadcast %cst_6 : f32 to vector<16x8xf32>
    %8 = arith.maximumf %6, %7 : vector<16x8xf32>
    %cst_7 = arith.constant dense<0xFF800000> : vector<16xf32>
    %9 = vector.multi_reduction <maximumf>, %8, %cst_7 [1] : vector<16x8xf32> to vector<16xf32>
    %10 = vector.shape_cast %9 : vector<16xf32> to vector<16x1xf32>
    %11 = vector.broadcast %10 : vector<16x1xf32> to vector<16x8xf32>
    %12 = arith.subf %8, %11 : vector<16x8xf32>
    %13 = math.exp %12 : vector<16x8xf32>
    %cst_8 = arith.constant dense<0.000000e+00> : vector<16xf32>
    %14 = vector.multi_reduction <add>, %13, %cst_8 [1] : vector<16x8xf32> to vector<16xf32>
    %15 = vector.shape_cast %14 : vector<16xf32> to vector<16x1xf32>
    %16 = tpu.reciprocal %15 : vector<16x1xf32> -> vector<16x1xf32>
    %17 = vector.broadcast %16 : vector<16x1xf32> to vector<16x8xf32>
    %18 = arith.mulf %13, %17 : vector<16x8xf32>
    %19 = vector.shape_cast %18 : vector<16x8xf32> to vector<2x8x8xf32>
    %c0_9 = arith.constant 0 : index
    %c0_10 = arith.constant 0 : index
    %c0_11 = arith.constant 0 : index
    %20 = vector.load %arg6[%c0_9, %c0_10, %c0_11] : memref<2x8x8xf32, #tpu.memory_space<vmem>>, vector<2x8x8xf32>
    tpu.vector_store %arg6[%c0_9, %c0_10, %c0_11], %19 {strides = array<i32>} : memref<2x8x8xf32, #tpu.memory_space<vmem>>, vector<2x8x8xf32>,
    %c0_12 = arith.constant 0 : index
    %c0_13 = arith.constant 0 : index
    %c0_14 = arith.constant 0 : index
    %21 = vector.load %arg5[%c0_12, %c0_13, %c0_14] : memref<2x8x32xf32, #tpu.memory_space<vmem>>, vector<2x8x32xf32>
    %cst_15 = arith.constant 0.000000e+00 : f32
    %22 = vector.broadcast %cst_15 : f32 to vector<2x8x32xf32>
    %23 = vector.extract_strided_slice %19 {offsets = [0, 0, 0], sizes = [2, 8, 1], strides = [1, 1, 1]} : vector<2x8x8xf32> to vector<2x8x1xf32>
    %24 = vector.extract_strided_slice %21 {offsets = [0, 0, 0], sizes = [2, 1, 32], strides = [1, 1, 1]} : vector<2x8x32xf32> to vector<2x1x32xf32>
    %25 = vector.broadcast %23 : vector<2x8x1xf32> to vector<2x8x32xf32>
    %26 = vector.broadcast %24 : vector<2x1x32xf32> to vector<2x8x32xf32>
    %27 = arith.mulf %25, %26 : vector<2x8x32xf32>
    %28 = arith.addf %22, %27 : vector<2x8x32xf32>
    %29 = vector.extract_strided_slice %19 {offsets = [0, 0, 1], sizes = [2, 8, 1], strides = [1, 1, 1]} : vector<2x8x8xf32> to vector<2x8x1xf32>
    %30 = vector.extract_strided_slice %21 {offsets = [0, 1, 0], sizes = [2, 1, 32], strides = [1, 1, 1]} : vector<2x8x32xf32> to vector<2x1x32xf32>
    %31 = vector.broadcast %29 : vector<2x8x1xf32> to vector<2x8x32xf32>
    %32 = vector.broadcast %30 : vector<2x1x32xf32> to vector<2x8x32xf32>
    %33 = arith.mulf %31, %32 : vector<2x8x32xf32>
    %34 = arith.addf %28, %33 : vector<2x8x32xf32>
    %35 = vector.extract_strided_slice %19 {offsets = [0, 0, 2], sizes = [2, 8, 1], strides = [1, 1, 1]} : vector<2x8x8xf32> to vector<2x8x1xf32>
    %36 = vector.extract_strided_slice %21 {offsets = [0, 2, 0], sizes = [2, 1, 32], strides = [1, 1, 1]} : vector<2x8x32xf32> to vector<2x1x32xf32>
    %37 = vector.broadcast %35 : vector<2x8x1xf32> to vector<2x8x32xf32>
    %38 = vector.broadcast %36 : vector<2x1x32xf32> to vector<2x8x32xf32>
    %39 = arith.mulf %37, %38 : vector<2x8x32xf32>
    %40 = arith.addf %34, %39 : vector<2x8x32xf32>
    %41 = vector.extract_strided_slice %19 {offsets = [0, 0, 3], sizes = [2, 8, 1], strides = [1, 1, 1]} : vector<2x8x8xf32> to vector<2x8x1xf32>
    %42 = vector.extract_strided_slice %21 {offsets = [0, 3, 0], sizes = [2, 1, 32], strides = [1, 1, 1]} : vector<2x8x32xf32> to vector<2x1x32xf32>
    %43 = vector.broadcast %41 : vector<2x8x1xf32> to vector<2x8x32xf32>
    %44 = vector.broadcast %42 : vector<2x1x32xf32> to vector<2x8x32xf32>
    %45 = arith.mulf %43, %44 : vector<2x8x32xf32>
    %46 = arith.addf %40, %45 : vector<2x8x32xf32>
    %47 = vector.extract_strided_slice %19 {offsets = [0, 0, 4], sizes = [2, 8, 1], strides = [1, 1, 1]} : vector<2x8x8xf32> to vector<2x8x1xf32>
    %48 = vector.extract_strided_slice %21 {offsets = [0, 4, 0], sizes = [2, 1, 32], strides = [1, 1, 1]} : vector<2x8x32xf32> to vector<2x1x32xf32>
    %49 = vector.broadcast %47 : vector<2x8x1xf32> to vector<2x8x32xf32>
    %50 = vector.broadcast %48 : vector<2x1x32xf32> to vector<2x8x32xf32>
    %51 = arith.mulf %49, %50 : vector<2x8x32xf32>
    %52 = arith.addf %46, %51 : vector<2x8x32xf32>
    %53 = vector.extract_strided_slice %19 {offsets = [0, 0, 5], sizes = [2, 8, 1], strides = [1, 1, 1]} : vector<2x8x8xf32> to vector<2x8x1xf32>
    %54 = vector.extract_strided_slice %21 {offsets = [0, 5, 0], sizes = [2, 1, 32], strides = [1, 1, 1]} : vector<2x8x32xf32> to vector<2x1x32xf32>
    %55 = vector.broadcast %53 : vector<2x8x1xf32> to vector<2x8x32xf32>
    %56 = vector.broadcast %54 : vector<2x1x32xf32> to vector<2x8x32xf32>
    %57 = arith.mulf %55, %56 : vector<2x8x32xf32>
    %58 = arith.addf %52, %57 : vector<2x8x32xf32>
    %59 = vector.extract_strided_slice %19 {offsets = [0, 0, 6], sizes = [2, 8, 1], strides = [1, 1, 1]} : vector<2x8x8xf32> to vector<2x8x1xf32>
    %60 = vector.extract_strided_slice %21 {offsets = [0, 6, 0], sizes = [2, 1, 32], strides = [1, 1, 1]} : vector<2x8x32xf32> to vector<2x1x32xf32>
    %61 = vector.broadcast %59 : vector<2x8x1xf32> to vector<2x8x32xf32>
    %62 = vector.broadcast %60 : vector<2x1x32xf32> to vector<2x8x32xf32>
    %63 = arith.mulf %61, %62 : vector<2x8x32xf32>
    %64 = arith.addf %58, %63 : vector<2x8x32xf32>
    %65 = vector.extract_strided_slice %19 {offsets = [0, 0, 7], sizes = [2, 8, 1], strides = [1, 1, 1]} : vector<2x8x8xf32> to vector<2x8x1xf32>
    %66 = vector.extract_strided_slice %21 {offsets = [0, 7, 0], sizes = [2, 1, 32], strides = [1, 1, 1]} : vector<2x8x32xf32> to vector<2x1x32xf32>
    %67 = vector.broadcast %65 : vector<2x8x1xf32> to vector<2x8x32xf32>
    %68 = vector.broadcast %66 : vector<2x1x32xf32> to vector<2x8x32xf32>
    %69 = arith.mulf %67, %68 : vector<2x8x32xf32>
    %70 = arith.addf %64, %69 : vector<2x8x32xf32>
    %c0_16 = arith.constant 0 : index
    %c0_17 = arith.constant 0 : index
    %c0_18 = arith.constant 0 : index
    %71 = vector.load %arg7[%c0_16, %c0_17, %c0_18] : memref<2x8x32xf32, #tpu.memory_space<vmem>>, vector<2x8x32xf32>
    tpu.vector_store %arg7[%c0_16, %c0_17, %c0_18], %70 {strides = array<i32>} : memref<2x8x32xf32, #tpu.memory_space<vmem>>, vector<2x8x32xf32>,
    return
  }
  func.func @transform_0(%arg0: i32, %arg1: i32) -> (i32, i32, i32) {
    %c0_i32 = arith.constant 0 : i32
    %c0_i32_0 = arith.constant 0 : i32
    return %arg0, %arg1, %c0_i32 : i32, i32, i32
  }
  func.func @transform_1(%arg0: i32, %arg1: i32) -> (i32, i32) {
    %c0_i32 = arith.constant 0 : i32
    %c0_i32_0 = arith.constant 0 : i32
    %c0_i32_1 = arith.constant 0 : i32
    return %c0_i32, %c0_i32_0 : i32, i32
  }
  func.func @transform_2(%arg0: i32, %arg1: i32) -> (i32, i32) {
    %c0_i32 = arith.constant 0 : i32
    %c0_i32_0 = arith.constant 0 : i32
    %c0_i32_1 = arith.constant 0 : i32
    return %c0_i32, %c0_i32_0 : i32, i32
  }
  func.func @transform_3(%arg0: i32, %arg1: i32) -> (i32, i32, i32) {
    %c0_i32 = arith.constant 0 : i32
    %c0_i32_0 = arith.constant 0 : i32
    %c0_i32_1 = arith.constant 0 : i32
    return %arg0, %c0_i32, %c0_i32_0 : i32, i32, i32
  }
  func.func @transform_4(%arg0: i32, %arg1: i32) -> (i32, i32, i32) {
    %c0_i32 = arith.constant 0 : i32
    %c0_i32_0 = arith.constant 0 : i32
    return %arg0, %arg1, %c0_i32 : i32, i32, i32
  }
  func.func @transform_5(%arg0: i32, %arg1: i32) -> (i32, i32, i32) {
    %c0_i32 = arith.constant 0 : i32
    %c0_i32_0 = arith.constant 0 : i32
    return %arg0, %arg1, %c0_i32 : i32, i32, i32
  }
}

</mosaic_0001>

<bundles_post_ra>
// kernel: tpu_custom_call.1
= control target key start
LH: loop header
LB: loop body
LE: loop exit
PB: predicated region body
PF: predicated region fallthrough
CT: control target
= control target key end

     0   :  { %11 = vsyncpa [#allocation3], 0  ;;  %vm38_vm0 = vcmask 1043456   ;;  %vm31_vm1 = vcmask 31744   ;;  %s547_s0 = inlined_call_operand.vmem [shape: f32[2,8,4], index: 0, kind: input, shape index: {}]   ;;  %s548_s1 = inlined_call_operand.vmem [shape: f32[4,8], index: 1, kind: input, shape index: {}]   ;;  %s549_s2 = inlined_call_operand.vmem [shape: f32[1,8], index: 2, kind: input, shape index: {}]   ;;  %s550_s3 = inlined_call_operand.vmem [shape: f32[2,8,32], index: 3, kind: input, shape index: {}]   ;;  %s551_s4 = inlined_call_operand.hbm [shape: f32[2,8,8], index: 4, kind: output, shape index: {0}]   ;;  %s552_s5 = inlined_call_operand.hbm [shape: f32[2,8,32], index: 5, kind: output, shape index: {1}]  }
   0x1   :  { %v23_v0 = vld [vmem:[%s548_s1] sm:$0xf]  ;;  %v22_v2 = vld [vmem:[%s547_s0 + $0x8] sm:$0xff] }
   0x2   :  { %v21_v1 = vld [vmem:[%s547_s0] sm:$0xff]  ;;  %350 = vmatprep.subr.msk.mxu0 %vm38_vm0, %v23_v0 }
   0x3   :  { %352 = vmatprep.mubr.msk.f32.mxu0 %vm31_vm1, %v21_v1 }
   0x4   :  { %12 = vsyncpa [#allocation5], 0  ;;  %351 = vmatpush3.msk.msra.mxu0 %vm38_vm0, %v23_v0  ;;  %v343_v3 = vld [vmem:[%s549_s2] ss:$0 sm:$0xff]  ;;  %vm119_vm2 = vcmask 64512   ;;  %v439_v22 = vmov 4  }
   0x5   :  { %353 = vmatmul.mubr.msk.f32.vlgmr.msra.gmra.mrb[0].mxu0 %vm31_vm1, %v22_v2  ;;  %371 = vset.pattern.permute.xlu0 %v439_v22  ;;  %v440_v23 = vmov 0   ;;  %v441_v30 = vmov 1   ;;  %v442_v31 = vmov 6   ;;  %v443_v32 = vmov 2   ;;  %s447_s0 = smov [#allocation2]  }
   0x6   :  { %367 = vset.pattern.permute.xlu1 %v440_v23  ;;  %v444_v33 = vmov 7   ;;  %v445_v34 = vmov 3   ;;  %v446_v35 = vmov 5   ;;  %s316_s1 = sshll.u32 %s447_s0, 4  ;;  %s317_s1 = int_to_ptr.vmem [resolvable:$true] %s316_s1 }
   0x7   :  { %s391_s2 = scalar_lea.vmem %s317_s1, 256  ;;  %p396_p1 = scmp.lt.s32.totalorder %s317_s1, %s317_s1 }
   0x8   :  { %p392_p0 = scmp.ne.s32.totalorder %s317_s1, %s391_s2  ;;  %p397_p2 = scmp.lt.s32.totalorder %s391_s2, %s391_s2 }
   0xa   :  { %p398_p3 = por %p397_p2, %p396_p1 }
   0xc   :  { %p399_p4 = pnand %p398_p3, %p392_p0 }
  0xd8   :  { %v354_v4 = vpop.f32.mrb[0].mxu0 }
  0xd9   :  { %v108_v5 = vpop.f32.mrb[1].mxu0  ;;  %v114_v6 = vadd.f32 %v354_v4, %v343_v3 }
  0xda   :  { %v109_v7 = vadd.f32 %v343_v3, %v108_v5 }
  0xdb   :  { %v118_v9 = vmax.f32 %v114_v6, 0.0 }
  0xdc   :  { %v117_v8 = vmax.f32 %v109_v7, 0.0 }
  0xdd   :  { %v123_v11 = vsel %vm119_vm2, %v118_v9, -inf }
  0xde   :  { %v120_v10 = vsel %vm119_vm2, %v117_v8, -inf }
  0xdf   :  { %121 = vmax.xlane.f32.xlu0 %v120_v10 }
  0xe3   :  { %124 = vmax.xlane.f32.xlu0 %v123_v11 }
 0x16c   :  { %v122_v12 = vpop.xlane.xlu0 %121 }
 0x16d   :  { %v126_v13 = vsub.f32 %v117_v8, %v122_v12 }
 0x16f   :  { %v128_v14 = vmul.f32 1.442695, %v126_v13 }
 0x170   :  { %v125_v15 = vpop.xlane.xlu0 %124 }
 0x171   :  { %383 = vpow2.f32 %v128_v14  ;;  %v127_v16 = vsub.f32 %v118_v9, %v125_v15 }
 0x173   :  { %v130_v17 = vmul.f32 1.442695, %v127_v16 }
 0x175   :  { %385 = vpow2.f32 %v130_v17 }
 0x17b   :  { %v384_v18 = vpop.eup %383 }
 0x17c   :  { %v132_v19 = vsel %vm119_vm2, %v384_v18, 0.0 }
 0x17d   :  { %133 = vadd.xlane.f32.xlu1 %v132_v19 }
 0x17f   :  { %v386_v20 = vpop.eup %385 }
 0x180   :  { %v135_v21 = vsel %vm119_vm2, %v386_v20, 0.0 }
 0x181   :  { %136 = vadd.xlane.f32.xlu1 %v135_v21 }
 0x20a   :  { %v134_v24 = vpop.xlane.xlu1 %133 }
 0x20b   :  { %387 = vrcp.f32 %v134_v24 }
 0x20e   :  { %v137_v25 = vpop.xlane.xlu1 %136 }
 0x20f   :  { %389 = vrcp.f32 %v137_v25 }
 0x215   :  { %v388_v26 = vpop.eup %387 }
 0x216   :  { %v140_v27 = vmul.f32 %v388_v26, %v384_v18 }
 0x218   :  { %142 = vst.msk [vmem:[#allocation2] sm:$0xff] %vm119_vm2, %v140_v27 }
 0x219   :  { %v390_v28 = vpop.eup %389 }
 0x21a   :  { %v141_v29 = vmul.f32 %v390_v28, %v386_v20 }
 0x21c   :  { %143 = vst.msk [vmem:[#allocation2 + $0x8] sm:$0xff] %vm119_vm2, %v141_v29  ;;  %233 = vperm.xlu0 %371, %v141_v29   ;;  %153 = vperm.xlu1 %367, %v141_v29  }
 0x220   :  { %374 = vset.pattern.permute.xlu0 %v440_v23  ;;  %368 = vset.pattern.permute.xlu1 %v441_v30 }
 0x221   :  { %148 = vperm.xlu0 %374, %v140_v27   ;;  %173 = vperm.xlu1 %368, %v141_v29  }
 0x225   :  { %380 = vset.pattern.permute.xlu0 %v442_v31  ;;  %369 = vset.pattern.permute.xlu1 %v443_v32 }
 0x226   :  { %269 = vperm.xlu0 %380, %v140_v27   ;;  %193 = vperm.xlu1 %369, %v141_v29  }
 0x22a   :  { %382 = vset.pattern.permute.xlu0 %v444_v33  ;;  %370 = vset.pattern.permute.xlu1 %v445_v34 }
 0x22b   :  { %293 = vperm.xlu0 %382, %v141_v29   ;;  %213 = vperm.xlu1 %370, %v141_v29  }
 0x22f   :  { %372 = vset.pattern.permute.xlu1 %v446_v35 }
 0x230   :  { %253 = vperm.xlu1 %372, %v141_v29  }
 0x234   :  { %373 = vset.pattern.permute.xlu1 %v442_v31 }
 0x235   :  { %273 = vperm.xlu1 %373, %v141_v29  }
 0x239   :  { %375 = vset.pattern.permute.xlu1 %v441_v30 }
 0x23a   :  { %169 = vperm.xlu1 %375, %v140_v27  }
 0x23e   :  { %376 = vset.pattern.permute.xlu1 %v443_v32 }
 0x23f   :  { %189 = vperm.xlu1 %376, %v140_v27  }
 0x243   :  { %377 = vset.pattern.permute.xlu1 %v445_v34 }
 0x244   :  { %209 = vperm.xlu1 %377, %v140_v27  }
 0x248   :  { %378 = vset.pattern.permute.xlu1 %v439_v22 }
 0x249   :  { %229 = vperm.xlu1 %378, %v140_v27  }
 0x24d   :  { %379 = vset.pattern.permute.xlu1 %v446_v35 }
 0x24e   :  { %249 = vperm.xlu1 %379, %v140_v27  }
 0x252   :  { %381 = vset.pattern.permute.xlu1 %v444_v33 }
 0x253   :  { %289 = vperm.xlu1 %381, %v140_v27  }
 0x254   :  { %402 = shalt.err (!%p399_p4)
}
 0x255   :  { %s403_s28 = scalar_lea.hbm %s551_s4, 256 }
 0x256   :  { %p404_p5 = scmp.ne.s32.totalorder %s551_s4, %s403_s28  ;;  %p407_p6 = scmp.lt.u32.totalorder %s403_s28, %s551_s4 }
 0x258   :  { %p409_p7 = pnand %p407_p6, %p404_p5 }
 0x25a   :  { %412 = shalt.err (!%p409_p7)
}
 0x25b   :  { %s448_s8 = smov 128   ;;  %s449_s9 = smov 8   ;;  %v156_v36 = vlaneseq  ;;  %v145_v42 = vld [vmem:[%s550_s3 + $0x8] sm:$0xff]  ;;  %vm308_vm3 = vcmask 261120   ;;  %v144_v18 = vld [vmem:[%s550_s3] sm:$0xff] }
 0x25c   :  { %322 = dma.vmem_to_hbm [thread:$0]  %s317_s1, 256, %s551_s4, [#allocation3], %s448_s8, %s448_s8, %s449_s9  }
 0x25d   :  { %v514_v37 = vshrl.u32 %v156_v36, 7  ;;  %s450_s3 = smov [#allocation4]  }
 0x25e   :  { %s328_s15 = sshll.u32 %s450_s3, 4  ;;  %s329_s15 = int_to_ptr.vmem [resolvable:$true] %s328_s15 }
 0x25f   :  { %v178_v39 = vsub.s32 1, %v514_v37  ;;  %v158_v40 = vsub.s32 0, %v514_v37  ;;  %v198_v41 = vsub.s32 2, %v514_v37  ;;  %v218_v48 = vsub.s32 3, %v514_v37  ;;  %s413_s16 = scalar_lea.vmem %s329_s15, 256  ;;  %p418_p9 = scmp.lt.s32.totalorder %s329_s15, %s329_s15 }
 0x260   :  { %v238_v51 = vsub.s32 4, %v514_v37  ;;  %v258_v57 = vsub.s32 5, %v514_v37  ;;  %v278_v2 = vsub.s32 6, %v514_v37  ;;  %v298_v3 = vsub.s32 7, %v514_v37  ;;  %p414_p8 = scmp.ne.s32.totalorder %s329_s15, %s413_s16  ;;  %p419_p10 = scmp.lt.s32.totalorder %s413_s16, %s413_s16 }
 0x261   :  { %v183_v44 = vrot.slane %v145_v42, %v178_v39  ;;  %v163_v46 = vrot.slane %v145_v42, %v158_v40  ;;  %v203_v47 = vrot.slane %v145_v42, %v198_v41  ;;  %v223_v54 = vrot.slane %v145_v42, %v218_v48 }
 0x262   :  { %v243_v59 = vrot.slane %v145_v42, %v238_v51  ;;  %v263_v63 = vrot.slane %v145_v42, %v258_v57  ;;  %v283_v7 = vrot.slane %v145_v42, %v278_v2  ;;  %v303_v8 = vrot.slane %v145_v42, %v298_v3  ;;  %p420_p11 = por %p419_p10, %p418_p9 }
 0x263   :  { %v179_v19 = vrot.slane %v144_v18, %v178_v39  ;;  %v159_v20 = vrot.slane %v144_v18, %v158_v40  ;;  %v199_v21 = vrot.slane %v144_v18, %v198_v41  ;;  %v219_v24 = vrot.slane %v144_v18, %v218_v48 }
 0x264   :  { %v239_v27 = vrot.slane %v144_v18, %v238_v51  ;;  %v259_v33 = vrot.slane %v144_v18, %v258_v57  ;;  %v279_v34 = vrot.slane %v144_v18, %v278_v2  ;;  %v299_v39 = vrot.slane %v144_v18, %v298_v3  ;;  %p421_p12 = pnand %p420_p11, %p414_p8 }
 0x29b   :  { %v154_v38 = vpop.permute.xlu1 %153  ;;  %v234_v45 = vpop.permute.xlu0 %233 }
 0x29c   :  { %v165_v52 = vmul.f32 %v163_v46, %v154_v38  ;;  %v245_v1 = vmul.f32 %v243_v59, %v234_v45 }
 0x2a0   :  { %v174_v43 = vpop.permute.xlu1 %173  ;;  %v149_v55 = vpop.permute.xlu0 %148 }
 0x2a1   :  { %v185_v49 = vmul.f32 %v183_v44, %v174_v43  ;;  %v164_v25 = vmul.f32 %v159_v20, %v149_v55 }
 0x2a3   :  { %v187_v56 = vadd.f32 %v185_v49, %v165_v52 }
 0x2a5   :  { %v194_v50 = vpop.permute.xlu1 %193  ;;  %v270_v0 = vpop.permute.xlu0 %269 }
 0x2a6   :  { %v205_v53 = vmul.f32 %v203_v47, %v194_v50  ;;  %v284_v40 = vmul.f32 %v279_v34, %v270_v0 }
 0x2a8   :  { %v207_v60 = vadd.f32 %v205_v53, %v187_v56 }
 0x2aa   :  { %v214_v58 = vpop.permute.xlu1 %213  ;;  %v294_v9 = vpop.permute.xlu0 %293 }
 0x2ab   :  { %v225_v61 = vmul.f32 %v223_v54, %v214_v58  ;;  %v305_v13 = vmul.f32 %v303_v8, %v294_v9 }
 0x2ad   :  { %v227_v62 = vadd.f32 %v225_v61, %v207_v60 }
 0x2af   :  { %v254_v4 = vpop.permute.xlu1 %253  ;;  %v247_v5 = vadd.f32 %v245_v1, %v227_v62 }
 0x2b0   :  { %v265_v6 = vmul.f32 %v263_v63, %v254_v4 }
 0x2b2   :  { %v267_v11 = vadd.f32 %v265_v6, %v247_v5 }
 0x2b4   :  { %v274_v10 = vpop.permute.xlu1 %273 }
 0x2b5   :  { %v285_v12 = vmul.f32 %v283_v7, %v274_v10 }
 0x2b7   :  { %v287_v14 = vadd.f32 %v285_v12, %v267_v11 }
 0x2b9   :  { %v307_v15 = vadd.f32 %v305_v13, %v287_v14  ;;  %v170_v16 = vpop.permute.xlu1 %169 }
 0x2ba   :  { %v184_v23 = vmul.f32 %v179_v19, %v170_v16 }
 0x2bb   :  { %310 = vst.msk [vmem:[#allocation4 + $0x8] sm:$0xff] %vm308_vm3, %v307_v15 }
 0x2bc   :  { %v186_v28 = vadd.f32 %v184_v23, %v164_v25 }
 0x2be   :  { %v190_v17 = vpop.permute.xlu1 %189 }
 0x2bf   :  { %v204_v26 = vmul.f32 %v199_v21, %v190_v17 }
 0x2c1   :  { %v206_v31 = vadd.f32 %v204_v26, %v186_v28 }
 0x2c3   :  { %v210_v22 = vpop.permute.xlu1 %209 }
 0x2c4   :  { %v224_v29 = vmul.f32 %v219_v24, %v210_v22 }
 0x2c6   :  { %v226_v35 = vadd.f32 %v224_v29, %v206_v31 }
 0x2c8   :  { %v230_v30 = vpop.permute.xlu1 %229 }
 0x2c9   :  { %v244_v32 = vmul.f32 %v239_v27, %v230_v30 }
 0x2cb   :  { %v246_v37 = vadd.f32 %v244_v32, %v226_v35 }
 0x2cd   :  { %v250_v36 = vpop.permute.xlu1 %249 }
 0x2ce   :  { %v264_v38 = vmul.f32 %v259_v33, %v250_v36 }
 0x2d0   :  { %v266_v41 = vadd.f32 %v264_v38, %v246_v37 }
 0x2d2   :  { %v286_v42 = vadd.f32 %v284_v40, %v266_v41  ;;  %v290_v43 = vpop.permute.xlu1 %289 }
 0x2d3   :  { %v304_v44 = vmul.f32 %v299_v39, %v290_v43 }
 0x2d5   :  { %v306_v45 = vadd.f32 %v304_v44, %v286_v42 }
 0x2d7   :  { %309 = vst.msk [vmem:[#allocation4] sm:$0xff] %vm308_vm3, %v306_v45 }
 0x2d8   :  { %424 = shalt.err (!%p421_p12)
}
 0x2d9   :  { %s425_s19 = scalar_lea.hbm %s552_s5, 256 }
 0x2da   :  { %p426_p13 = scmp.ne.s32.totalorder %s552_s5, %s425_s19  ;;  %p429_p0 = scmp.lt.u32.totalorder %s425_s19, %s552_s5 }
 0x2dc   :  { %p431_p1 = pnand %p429_p0, %p426_p13 }
 0x2de   :  { %434 = shalt.err (!%p431_p1)
}
 0x2df   :  { %334 = dma.vmem_to_hbm [thread:$0]  %s329_s15, 256, %s552_s5, [#allocation5], %s448_s8, %s448_s8, %s449_s9  }
 0x2e0   :  { %435 = dma.done.wait [#allocation3], 256  }
 0x2e1   :  { %436 = vsyncadd [#allocation3], 4294967040 }
 0x2e2   :  { %437 = dma.done.wait [#allocation5], 256  }
 0x2e3   :  { %438 = vsyncadd [#allocation5], 4294967040 }
 0x2e4   :  { %341 = vsyncpa [#allocation3], 1 }
 0x2e5   :  { %342 = vsyncpa [#allocation5], 1 }

</bundles_post_ra>
